<compile_context>
chip_gen: v7x
topology: tpu7x:2x2x1
jax: 0.10.0
libtpu: 0.0.40
codegen_flags: <defaults>
</compile_context>

<pallas_src>
import jax
import jax.numpy as jnp
from jax.experimental import pallas as pl
from jax.experimental.pallas import tpu as pltpu


def _diag_linear_kernel(x_ref, d_ref, o_ref):
    # x_ref: (tr, tf); d_ref: (1, tf) broadcasts over the sublane (row) axis.
    o_ref[...] = (x_ref[...] * d_ref[...]).astype(o_ref.dtype)


def _tpu_memory_params():
    """Generation-aware (target_block_bytes, vmem_limit_cap)."""
    vmem_cap = None
    try:
        info = pltpu.get_tpu_info()
        vmem_cap = int(getattr(info, "vmem_capacity_bytes"))
    except Exception:
        vmem_cap = None
    if vmem_cap is None or vmem_cap <= 64 * 1024 * 1024:
        # v7x-class: 64 MiB physical VMEM per TC.  6 MiB blocks -> 2x(in)+2x(out)
        # = 24 MiB pipelined, comfortably under a 48 MiB limit, and the fixed
        # per-step overhead drops below ~7% of step time at 3.2 TB/s HBM.
        return 6 * 1024 * 1024, 48 * 1024 * 1024
    # v5e / v6e: 128 MiB physical VMEM.  8 MiB blocks are past the measured
    # throughput knee (4 MiB block ~ 86% of HBM roofline) and fit trivially.
    return 8 * 1024 * 1024, 96 * 1024 * 1024


def _choose_tiles(rows, feat, itemsize, target_bytes):
    """Pick (tile_rows, tile_feat, sublane_granule) for ~target_bytes blocks."""
    # Sub-32-bit dtypes pack along sublanes: native packed tile rows are
    # 8 (f32), 16 (bf16), 32 (int8/fp8).  Round row tiles to that granule.
    sublane = max(8, 32 // max(1, itemsize))
    # Feature tile: keep the full (lane-dense) extent unless even a
    # minimal-row block blows the budget; then tile in 128-multiples
    # regardless of whether feat is 128-aligned (cdiv grid masks the partial
    # last feature block), so wide unaligned feature dims can't blow VMEM.
    if sublane * feat * itemsize > target_bytes:
        tf = (target_bytes // (sublane * itemsize)) // 128 * 128
        tf = max(128, tf)
        if tf >= feat:
            tf = feat
    else:
        tf = feat
    # Row tile: biggest multiple of the packed granule within budget.
    tr = target_bytes // (tf * itemsize)
    tr = max(sublane, (tr // sublane) * sublane)
    if tr >= rows:
        tr = rows          # full-extent block is always legal
    return tr, tf, sublane


def diagonal_linear(x, diag, *, tile_rows=None, tile_features=None,
                    donate_input=False):
    """Computes x @ diag(diag): scales the last axis of x by the vector diag."""
    feature_size = diag.shape[-1]
    assert x.shape[-1] == feature_size, "last dim of x must match diag size"

    orig_shape = x.shape
    out_dtype = x.dtype

    x2d = x.reshape(-1, feature_size)
    # Note: casting diag to the activation dtype (e.g. bf16) before the
    # multiply adds one rounding vs. multiplying in f32 and rounding once;
    # acceptable for this module, but it is a deliberate choice to keep the
    # in-kernel multiply on the narrow VPU path.
    d_row = diag.astype(out_dtype).reshape(1, feature_size)
    rows, feat = x2d.shape
    orig_rows = rows

    # Lane-density: if the feature axis is narrower than one vreg lane group
    # (<128), fold rows into the lane axis so every store is an unmasked
    # full-width vst.  When rows isn't divisible we pad (one extra copy of a
    # few rows) rather than fall back to masked narrow-lane stores for the
    # whole tensor.
    fold_k = 1
    if 0 < feat < 128 and 128 % feat == 0:
        fold_k = 128 // feat
        pad = (-rows) % fold_k
        if pad:
            x2d = jnp.pad(x2d, ((0, pad), (0, 0)))
        rows = (rows + pad) // fold_k
        x2d = x2d.reshape(rows, fold_k * feat)
        d_row = jnp.tile(d_row, (1, fold_k))
        feat = fold_k * feature_size

    itemsize = jnp.dtype(out_dtype).itemsize
    target_bytes, vmem_cap = _tpu_memory_params()
    auto_tr, auto_tf, _ = _choose_tiles(rows, feat, itemsize, target_bytes)
    tr = min(tile_rows, rows) if tile_rows is not None else auto_tr
    tf = min(tile_features, feat) if tile_features is not None else auto_tf
    # (8, 128) rule: blocks smaller than the full extent must be (8,128)-aligned.
    if tr < rows:
        assert tr % 8 == 0, "tile_rows must be a multiple of 8"
    if tf < feat:
        assert tf % 128 == 0, "tile_features must be a multiple of 128"

    # Pipelined VMEM: (in + out) blocks double-buffered, plus the tiny diag
    # row (also double-buffered).  Keep the explicit limit under the
    # generation-aware cap so the scoped default never rejects the blocks.
    block_bytes = tr * tf * itemsize
    vmem_needed = 2 * 2 * block_bytes + 2 * tf * itemsize
    vmem_limit = int(min(vmem_cap, max(2 * vmem_needed, 16 * 1024 * 1024)))

    if tf == feat:
        # Common case: feature dim fits in one block.  Collapse to a 1-D grid
        # over rows; the diag block index is constant, so it is DMA'd once.
        grid = (pl.cdiv(rows, tr),)
        in_specs = [
            pl.BlockSpec((tr, feat), lambda i: (i, 0)),
            pl.BlockSpec((1, feat), lambda i: (0, 0)),
        ]
        out_specs = pl.BlockSpec((tr, feat), lambda i: (i, 0))
        dim_sem = ("parallel",)
    else:
        # Feature axis OUTER, rows inner: the diag block index (0, j) is
        # constant across all inner row steps, so the pipeline skips its
        # per-step re-DMA.
        grid = (pl.cdiv(feat, tf), pl.cdiv(rows, tr))
        in_specs = [
            pl.BlockSpec((tr, tf), lambda j, i: (i, j)),
            pl.BlockSpec((1, tf), lambda j, i: (0, j)),
        ]
        out_specs = pl.BlockSpec((tr, tf), lambda j, i: (i, j))
        dim_sem = ("parallel", "parallel")

    # NOTE: pipeline_mode=pl.Buffered(3) on the x input is a possible further
    # tweak on v7x if an xprof trace shows exposed DMA-issue gaps; not applied
    # by default since it costs one more block of the scarcer 64 MiB VMEM.
    out2d = pl.pallas_call(
        _diag_linear_kernel,
        out_shape=jax.ShapeDtypeStruct((rows, feat), out_dtype),
        grid_spec=pltpu.PrefetchScalarGridSpec(
            num_scalar_prefetch=0,
            grid=grid,
            in_specs=in_specs,
            out_specs=out_specs,
        ),
        compiler_params=pltpu.CompilerParams(
            # Sharded across the two TensorCores on v7x; no-op on v5e/v6e.
            dimension_semantics=dim_sem,
            vmem_limit_bytes=vmem_limit,
        ),
        # Optional in-place update of large activations when the caller can
        # donate x (same HBM bytes moved, but avoids a second rows x F buffer).
        input_output_aliases=({0: 0} if donate_input else {}),
    )(x2d, d_row)

    if fold_k > 1:
        out2d = out2d.reshape(rows * fold_k, feature_size)[:orig_rows]
    return out2d.reshape(orig_shape)


if __name__ == "__main__":
    key = jax.random.PRNGKey(0)
    kx, kd = jax.random.split(key)

    # Primary case: (batch, seq, feature) with feature on the lane axis.
    batch, seq, feature_size = 2, 8, 128
    x = jax.random.normal(kx, (batch, seq, feature_size), dtype=jnp.float32)
    diag = jnp.ones((feature_size,), dtype=jnp.float32) + \
        0.1 * jax.random.normal(kd, (feature_size,), dtype=jnp.float32)
    out = jax.block_until_ready(diagonal_linear(x, diag))
    ref = x * diag[None, None, :]
    assert out.shape == x.shape
    assert jnp.allclose(out, ref, atol=1e-6, rtol=1e-6)

    # Narrow-feature case (F=64), rows divisible by fold factor: free fold.
    x2 = jax.random.normal(kx, (3, 10, 64), dtype=jnp.float32)
    d2 = 1.0 + 0.05 * jax.random.normal(kd, (64,), dtype=jnp.float32)
    out2 = jax.block_until_ready(diagonal_linear(x2, d2))
    assert jnp.allclose(out2, x2 * d2[None, None, :], atol=1e-6, rtol=1e-6)

    # Narrow-feature case with rows NOT divisible by 128//F: padded fold path.
    x2b = jax.random.normal(kx, (3, 11, 64), dtype=jnp.float32)
    out2b = jax.block_until_ready(diagonal_linear(x2b, d2))
    assert out2b.shape == x2b.shape
    assert jnp.allclose(out2b, x2b * d2[None, None, :], atol=1e-6, rtol=1e-6)

    # Forced small tiles: 2-D grid (feature outer), partial last row block.
    x3 = jax.random.normal(kx, (1, 20, 256), dtype=jnp.float32)
    d3 = 1.0 + 0.05 * jax.random.normal(kd, (256,), dtype=jnp.float32)
    out3 = jax.block_until_ready(
        diagonal_linear(x3, d3, tile_rows=8, tile_features=128))
    assert jnp.allclose(out3, x3 * d3[None, None, :], atol=1e-6, rtol=1e-6)

    # Feature dim not a multiple of the feature tile (partial feature block).
    x4 = jax.random.normal(kx, (1, 16, 320), dtype=jnp.float32)
    d4 = 1.0 + 0.05 * jax.random.normal(kd, (320,), dtype=jnp.float32)
    out4 = jax.block_until_ready(
        diagonal_linear(x4, d4, tile_rows=8, tile_features=128))
    assert jnp.allclose(out4, x4 * d4[None, None, :], atol=1e-6, rtol=1e-6)

    # bf16 activations: diag is cast inside the wrapper, multiply stays bf16.
    xb = x.astype(jnp.bfloat16)
    outb = jax.block_until_ready(diagonal_linear(xb, diag))
    refb = xb * diag.astype(jnp.bfloat16)[None, None, :]
    assert jnp.allclose(outb.astype(jnp.float32), refb.astype(jnp.float32),
                        atol=1e-2, rtol=1e-2)

    print("KERNEL_OK")
</pallas_src>

<mosaic_0001>
module attributes {stable_mosaic.version = 11 : i64} {
  func.func @_diag_linear_kernel(%arg0: i32, %arg1: memref<16x128xf32, #tpu.memory_space<vmem>>, %arg2: memref<1x128xf32, #tpu.memory_space<vmem>>, %arg3: memref<16x128xf32, #tpu.memory_space<vmem>>) attributes {dimension_semantics = [#tpu.dimension_semantics<parallel>], iteration_bounds = array<i64: 1>, scalar_prefetch = 0 : i64, scratch_operands = 0 : i64, tpu.core_type = #tpu.core_type<tc>, window_params = [{transform_indices = @transform_0, window_bounds = array<i64: 16, 128>}, {pipeline_mode = #tpu.pipeline_mode<synchronous>, transform_indices = @transform_1, window_bounds = array<i64: 1, 128>}, {transform_indices = @transform_2, window_bounds = array<i64: 16, 128>}]} {
    %c0 = arith.constant 0 : index
    %c0_0 = arith.constant 0 : index
    %0 = vector.load %arg1[%c0, %c0_0] : memref<16x128xf32, #tpu.memory_space<vmem>>, vector<16x128xf32>
    %c0_1 = arith.constant 0 : index
    %c0_2 = arith.constant 0 : index
    %1 = vector.load %arg2[%c0_1, %c0_2] : memref<1x128xf32, #tpu.memory_space<vmem>>, vector<1x128xf32>
    %2 = vector.broadcast %1 : vector<1x128xf32> to vector<16x128xf32>
    %3 = arith.mulf %0, %2 : vector<16x128xf32>
    %c0_3 = arith.constant 0 : index
    %c0_4 = arith.constant 0 : index
    %4 = vector.load %arg3[%c0_3, %c0_4] : memref<16x128xf32, #tpu.memory_space<vmem>>, vector<16x128xf32>
    tpu.vector_store %arg3[%c0_3, %c0_4], %3 {strides = array<i32>} : memref<16x128xf32, #tpu.memory_space<vmem>>, vector<16x128xf32>,
    return
  }
  func.func @transform_0(%arg0: i32) -> (i32, i32) {
    %c0_i32 = arith.constant 0 : i32
    %c0_i32_0 = arith.constant 0 : i32
    return %arg0, %c0_i32 : i32, i32
  }
  func.func @transform_1(%arg0: i32) -> (i32, i32) {
    %c0_i32 = arith.constant 0 : i32
    %c0_i32_0 = arith.constant 0 : i32
    %c0_i32_1 = arith.constant 0 : i32
    return %c0_i32, %c0_i32_0 : i32, i32
  }
  func.func @transform_2(%arg0: i32) -> (i32, i32) {
    %c0_i32 = arith.constant 0 : i32
    %c0_i32_0 = arith.constant 0 : i32
    return %arg0, %c0_i32 : i32, i32
  }
}

</mosaic_0001>

<bundles_post_ra>
// kernel: tpu_custom_call.1
= control target key start
LH: loop header
LB: loop body
LE: loop exit
PB: predicated region body
PF: predicated region fallthrough
CT: control target
= control target key end

     0   :  { %7 = vsyncpa [#allocation3], 0  ;;  %s161_s0 = inlined_call_operand.hbm [shape: f32[16,128], index: 0, kind: input, shape index: {}]   ;;  %s162_s1 = inlined_call_operand.vmem [shape: f32[1,128], index: 1, kind: input, shape index: {}]   ;;  %s163_s2 = inlined_call_operand.hbm [shape: f32[16,128], index: 2, kind: output, shape index: {}]  }
   0x1   :  { %8 = vsyncpa [#allocation4], 0  ;;  %s109_s9 = smov [#allocation2]   ;;  %s61_s13 = scalar_lea.hbm %s161_s0, 256 }
   0x2   :  { %s14_s10 = sshll.u32 %s109_s9, 4  ;;  %p62_p0 = scmp.ne.s32.totalorder %s161_s0, %s61_s13  ;;  %s15_s10 = int_to_ptr.vmem [resolvable:$true] %s14_s10 }
   0x3   :  { %p65_p1 = scmp.lt.u32.totalorder %s61_s13, %s161_s0 }
   0x5   :  { %p67_p2 = pnand %p65_p1, %p62_p0 }
   0x7   :  { %70 = shalt.err (!%p67_p2)
}
   0x8   :  { %s71_s18 = scalar_lea.vmem %s15_s10, 256  ;;  %p76_p4 = scmp.lt.s32.totalorder %s15_s10, %s15_s10 }
   0x9   :  { %p72_p3 = scmp.ne.s32.totalorder %s15_s10, %s71_s18  ;;  %p77_p5 = scmp.lt.s32.totalorder %s71_s18, %s71_s18 }
   0xb   :  { %p78_p6 = por %p77_p5, %p76_p4 }
   0xd   :  { %p79_p7 = pnand %p78_p6, %p72_p3 }
   0xf   :  { %82 = shalt.err (!%p79_p7)
}
  0x10   :  { %s110_s19 = smov 128   ;;  %s111_s20 = smov 8  }
  0x11   :  { %20 = dma.hbm_to_vmem [thread:$0]  %s161_s0, 256, %s15_s10, [#allocation3], %s110_s19, %s110_s19, %s111_s20  }
  0x12   :  { %105 = dma.done.wait [#allocation3], 256  }
  0x13   :  { %106 = vsyncadd [#allocation3], 4294967040  ;;  %s112_s23 = smov [#allocation5]   ;;  %v26_v0 = vld [vmem:[#allocation2] sm:$0xff]  ;;  %v27_v2 = vld [vmem:[#allocation2 + $0x8] sm:$0xff] }
  0x14   :  { %s44_s24 = sshll.u32 %s112_s23, 4  ;;  %v56_v1 = vld [vmem:[%s162_s1] ss:$0 sm:$0xff]  ;;  %s45_s24 = int_to_ptr.vmem [resolvable:$true] %s44_s24 }
  0x15   :  { %v35_v3 = vmul.f32 %v56_v1, %v26_v0  ;;  %v36_v4 = vmul.f32 %v56_v1, %v27_v2  ;;  %s83_s27 = scalar_lea.vmem %s45_s24, 256  ;;  %p88_p9 = scmp.lt.s32.totalorder %s45_s24, %s45_s24 }
  0x16   :  { %p84_p8 = scmp.ne.s32.totalorder %s45_s24, %s83_s27  ;;  %p89_p10 = scmp.lt.s32.totalorder %s83_s27, %s83_s27 }
  0x17   :  { %37 = vst [vmem:[#allocation5] sm:$0xff] %v35_v3  ;;  %38 = vst [vmem:[#allocation5 + $0x8] sm:$0xff] %v36_v4 }
  0x18   :  { %p90_p11 = por %p89_p10, %p88_p9 }
  0x1a   :  { %p91_p12 = pnand %p90_p11, %p84_p8 }
  0x1c   :  { %94 = shalt.err (!%p91_p12)
}
  0x1d   :  { %s95_s29 = scalar_lea.hbm %s163_s2, 256 }
  0x1e   :  { %p96_p13 = scmp.ne.s32.totalorder %s163_s2, %s95_s29  ;;  %p99_p0 = scmp.lt.u32.totalorder %s95_s29, %s163_s2 }
  0x20   :  { %p101_p1 = pnand %p99_p0, %p96_p13 }
  0x22   :  { %104 = shalt.err (!%p101_p1)
}
  0x23   :  { %50 = dma.vmem_to_hbm [thread:$0]  %s45_s24, 256, %s163_s2, [#allocation4], %s110_s19, %s110_s19, %s111_s20  }
  0x24   :  { %107 = dma.done.wait [#allocation4], 256  }
  0x25   :  { %108 = vsyncadd [#allocation4], 4294967040 }
  0x26   :  { %54 = vsyncpa [#allocation3], 1 }
  0x27   :  { %55 = vsyncpa [#allocation4], 1 }

</bundles_post_ra>
